<compile_context>
chip_gen: v7x
topology: tpu7x:2x2x1
jax: 0.10.0
libtpu: 0.0.40
codegen_flags: <defaults>
</compile_context>

<pallas_src>
import jax
import jax.numpy as jnp
from jax.experimental import pallas as pl
from jax.experimental.pallas import tpu as pltpu


_NSEM = 8  # max outstanding row DMAs per grid step


def _round_up(x, m):
    return ((x + m - 1) // m) * m


def _gather_rows_kernel(ids_ref, table_ref, out_ref, stage_ref, copy_sems):
    # ids_ref:   SMEM (N_pad,) int32 token ids (scalar prefetch)
    # table_ref: (V, E) embedding table, left in HBM (pl.ANY)
    # out_ref:   (token_tile, E) VMEM output block
    # stage_ref: (token_tile, E) VMEM staging buffer (scratch)
    # copy_sems: (_NSEM,) DMA semaphores
    tile = out_ref.shape[0]
    base = pl.program_id(0) * tile

    def row_copy(r):
        row_id = ids_ref[base + r]
        return pltpu.make_async_copy(
            table_ref.at[row_id],            # one (E,) row in HBM
            stage_ref.at[r],                 # one (E,) row in VMEM
            copy_sems.at[r % _NSEM],
        )

    n_prime = min(_NSEM, tile)

    # Prime the DMA window.
    @pl.loop(0, n_prime)
    def _prime(r):
        row_copy(r).start()

    # Steady state: retire the oldest copy in this semaphore slot, issue next.
    @pl.loop(n_prime, tile)
    def _steady(r):
        row_copy(r - n_prime).wait()
        row_copy(r).start()

    # Drain remaining in-flight copies.
    @pl.loop(tile - n_prime, tile)
    def _drain(r):
        row_copy(r).wait()

    # Lane-dense (token_tile, E) store; pipeline writes this block to HBM.
    out_ref[...] = stage_ref[...]


def embedding_lookup_pallas(ids_flat, table, *, token_tile=256):
    """Gather rows of `table` at `ids_flat` via a Pallas DMA row-gather kernel."""
    n = ids_flat.shape[0]
    v, e = table.shape

    # Clamp ids (no runtime OOB check on TPU DMAs) and pad N to a tile multiple.
    ids = jnp.clip(ids_flat.astype(jnp.int32), 0, v - 1)
    token_tile = _round_up(max(8, min(token_tile, _round_up(n, 8))), 8)
    n_pad = _round_up(n, token_tile)
    if n_pad != n:
        ids = jnp.pad(ids, (0, n_pad - n))  # padded slots gather row 0 (discarded)

    out = pl.pallas_call(
        _gather_rows_kernel,
        out_shape=jax.ShapeDtypeStruct((n_pad, e), table.dtype),
        grid_spec=pltpu.PrefetchScalarGridSpec(
            num_scalar_prefetch=1,                      # ids -> SMEM
            grid=(n_pad // token_tile,),
            in_specs=[
                pl.BlockSpec(memory_space=pl.ANY),      # table stays in HBM
            ],
            out_specs=pl.BlockSpec((token_tile, e), lambda i, ids: (i, 0)),
            scratch_shapes=[
                pltpu.VMEM((token_tile, e), table.dtype),
                pltpu.SemaphoreType.DMA((_NSEM,)),
            ],
        ),
        compiler_params=pltpu.CompilerParams(
            dimension_semantics=("parallel",),          # independent token tiles
        ),
    )(ids, table)

    return out[:n]


def column_parallel_output_head(x_tokens, table, tp_size, *, token_tile=256):
    """x_tokens: (B, S) int32, table: (V, E) f32 -> (tp, (B//tp)*S, E) f32."""
    b, s = x_tokens.shape
    assert b % tp_size == 0, "torch.cat(torch.split(...)) requires B % tp_size == 0"
    n_chunks = b // tp_size
    # torch.cat(torch.split(emb, tp), dim=1): out[i, c*S + t] = emb[c*tp + i, t]
    # The gather commutes with this pure index rearrangement, so rearrange the
    # token ids first (cheap glue), then run a single gather kernel.
    x_r = x_tokens.reshape(n_chunks, tp_size, s).transpose(1, 0, 2)  # (tp, chunks, S)
    ids_flat = x_r.reshape(tp_size * n_chunks * s)
    out_flat = embedding_lookup_pallas(ids_flat, table, token_tile=token_tile)
    return out_flat.reshape(tp_size, n_chunks * s, table.shape[1])


if __name__ == "__main__":
    B, S = 8, 8          # batch of token sequences
    V, E = 32, 128       # vocab_size, embed_size
    TP = 2               # tp_group.size()

    key = jax.random.PRNGKey(0)
    k_tok, k_emb = jax.random.split(key)
    x_tokens = jax.random.randint(k_tok, (B, S), 0, V, dtype=jnp.int32)
    # nn.Embedding default init: N(0, 1)
    table = jax.random.normal(k_emb, (V, E), dtype=jnp.float32)

    out = column_parallel_output_head(x_tokens, table, TP)
    out = jax.block_until_ready(out)

    # Pure-JAX reference of the PyTorch forward.
    emb = table[x_tokens]                                          # (B, S, E)
    chunks = [emb[c * TP:(c + 1) * TP] for c in range(B // TP)]    # split along dim 0
    ref = jnp.concatenate(chunks, axis=1)                          # cat along dim 1

    assert out.shape == (TP, (B // TP) * S, E)
    assert jnp.allclose(out, ref, rtol=1e-6, atol=1e-6), "mismatch vs reference"
    print("KERNEL_OK")
</pallas_src>

<mosaic_0001>
module attributes {stable_mosaic.version = 11 : i64} {
  func.func @_gather_rows_kernel(%arg0: i32, %arg1: memref<64xi32, #tpu.memory_space<smem>>, %arg2: memref<32x128xf32, #tpu.memory_space<any>>, %arg3: memref<64x128xf32, #tpu.memory_space<vmem>>, %arg4: memref<64x128xf32, #tpu.memory_space<vmem>>, %arg5: memref<8x!tpu.dma_semaphore, #tpu.memory_space<semaphore_mem>>) attributes {dimension_semantics = [#tpu.dimension_semantics<parallel>], iteration_bounds = array<i64: 1>, scalar_prefetch = 1 : i64, scratch_operands = 2 : i64, tpu.core_type = #tpu.core_type<tc>, window_params = [{}, {transform_indices = @transform_1, window_bounds = array<i64: 64, 128>}]} {
    %c64_i32 = arith.constant 64 : i32
    %0 = arith.muli %arg0, %c64_i32 : i32
    %c0_i32 = arith.constant 0 : i32
    %c8_i32 = arith.constant 8 : i32
    %1 = arith.addi %c0_i32, %c8_i32 : i32
    %c1_i32 = arith.constant 1 : i32
    scf.for %arg6 = %c0_i32 to %1 step %c1_i32  : i32 {
      %c1_i32_11 = arith.constant 1 : i32
      %6 = arith.muli %arg6, %c1_i32_11 : i32
      %c0_i32_12 = arith.constant 0 : i32
      %7 = arith.addi %c0_i32_12, %6 : i32
      %8 = arith.addi %0, %7 : i32
      %9 = arith.index_cast %8 : i32 to index
      %10 = memref.load %arg1[%9] : memref<64xi32, #tpu.memory_space<smem>>
      %c8_i32_13 = arith.constant 8 : i32
      %c0_i32_14 = arith.constant 0 : i32
      %11 = arith.cmpi eq, %c8_i32_13, %c0_i32_14 : i32
      %c1_i32_15 = arith.constant 1 : i32
      %12 = arith.select %11, %c1_i32_15, %c8_i32_13 : i32
      %13 = arith.remsi %7, %12 : i32
      %c0_i32_16 = arith.constant 0 : i32
      %14 = arith.cmpi ne, %13, %c0_i32_16 : i32
      %c0_i32_17 = arith.constant 0 : i32
      %15 = arith.cmpi slt, %13, %c0_i32_17 : i32
      %c0_i32_18 = arith.constant 0 : i32
      %16 = arith.cmpi slt, %12, %c0_i32_18 : i32
      %17 = arith.xori %15, %16 : i1
      %18 = arith.andi %17, %14 : i1
      %19 = arith.addi %13, %12 : i32
      %20 = arith.select %18, %19, %13 : i32
      %c0_i32_19 = arith.constant 0 : i32
      %21 = tpu.memref_slice %arg2[%10, %c0_i32_19] : memref<32x128xf32, #tpu.memory_space<any>> -> memref<1x128xf32, #tpu.memory_space<any>>
      %22 = tpu.memref_squeeze %21 : memref<1x128xf32, #tpu.memory_space<any>> -> memref<128xf32, #tpu.memory_space<any>>
      %c0_i32_20 = arith.constant 0 : i32
      %23 = tpu.memref_slice %arg4[%7, %c0_i32_20] : memref<64x128xf32, #tpu.memory_space<vmem>> -> memref<1x128xf32, #tpu.memory_space<vmem>>
      %24 = tpu.memref_squeeze %23 : memref<1x128xf32, #tpu.memory_space<vmem>> -> memref<128xf32, #tpu.memory_space<vmem>>
      %25 = tpu.memref_slice %arg5[%20] : memref<8x!tpu.dma_semaphore, #tpu.memory_space<semaphore_mem>> -> memref<1x!tpu.dma_semaphore, #tpu.memory_space<semaphore_mem>>
      %26 = tpu.memref_squeeze %25 : memref<1x!tpu.dma_semaphore, #tpu.memory_space<semaphore_mem>> -> memref<!tpu.dma_semaphore, #tpu.memory_space<semaphore_mem>>
      tpu.enqueue_dma source(%22 : memref<128xf32, #tpu.memory_space<any>>) target(%24 : memref<128xf32, #tpu.memory_space<vmem>>) target_semaphore(%26 : memref<!tpu.dma_semaphore, #tpu.memory_space<semaphore_mem>>)
    }
    %c8_i32_0 = arith.constant 8 : i32
    %c0_i32_1 = arith.constant 0 : i32
    %c56_i32 = arith.constant 56 : i32
    %2 = arith.addi %c0_i32_1, %c56_i32 : i32
    %c1_i32_2 = arith.constant 1 : i32
    scf.for %arg6 = %c0_i32_1 to %2 step %c1_i32_2  : i32 {
      %c1_i32_11 = arith.constant 1 : i32
      %6 = arith.muli %arg6, %c1_i32_11 : i32
      %c8_i32_12 = arith.constant 8 : i32
      %7 = arith.addi %c8_i32_12, %6 : i32
      %c8_i32_13 = arith.constant 8 : i32
      %8 = arith.subi %7, %c8_i32_13 : i32
      %9 = arith.addi %0, %8 : i32
      %10 = arith.index_cast %9 : i32 to index
      %11 = memref.load %arg1[%10] : memref<64xi32, #tpu.memory_space<smem>>
      %c8_i32_14 = arith.constant 8 : i32
      %c0_i32_15 = arith.constant 0 : i32
      %12 = arith.cmpi eq, %c8_i32_14, %c0_i32_15 : i32
      %c1_i32_16 = arith.constant 1 : i32
      %13 = arith.select %12, %c1_i32_16, %c8_i32_14 : i32
      %14 = arith.remsi %8, %13 : i32
      %c0_i32_17 = arith.constant 0 : i32
      %15 = arith.cmpi ne, %14, %c0_i32_17 : i32
      %c0_i32_18 = arith.constant 0 : i32
      %16 = arith.cmpi slt, %14, %c0_i32_18 : i32
      %c0_i32_19 = arith.constant 0 : i32
      %17 = arith.cmpi slt, %13, %c0_i32_19 : i32
      %18 = arith.xori %16, %17 : i1
      %19 = arith.andi %18, %15 : i1
      %20 = arith.addi %14, %13 : i32
      %21 = arith.select %19, %20, %14 : i32
      %c0_i32_20 = arith.constant 0 : i32
      %22 = tpu.memref_slice %arg2[%11, %c0_i32_20] : memref<32x128xf32, #tpu.memory_space<any>> -> memref<1x128xf32, #tpu.memory_space<any>>
      %23 = tpu.memref_squeeze %22 : memref<1x128xf32, #tpu.memory_space<any>> -> memref<128xf32, #tpu.memory_space<any>>
      %c0_i32_21 = arith.constant 0 : i32
      %24 = tpu.memref_slice %arg4[%8, %c0_i32_21] : memref<64x128xf32, #tpu.memory_space<vmem>> -> memref<1x128xf32, #tpu.memory_space<vmem>>
      %25 = tpu.memref_squeeze %24 : memref<1x128xf32, #tpu.memory_space<vmem>> -> memref<128xf32, #tpu.memory_space<vmem>>
      %26 = tpu.memref_slice %arg5[%21] : memref<8x!tpu.dma_semaphore, #tpu.memory_space<semaphore_mem>> -> memref<1x!tpu.dma_semaphore, #tpu.memory_space<semaphore_mem>>
      %27 = tpu.memref_squeeze %26 : memref<1x!tpu.dma_semaphore, #tpu.memory_space<semaphore_mem>> -> memref<!tpu.dma_semaphore, #tpu.memory_space<semaphore_mem>>
      tpu.wait_dma2 semaphore(%27 : memref<!tpu.dma_semaphore, #tpu.memory_space<semaphore_mem>>) src(%23 : memref<128xf32, #tpu.memory_space<any>>) dst(%25 : memref<128xf32, #tpu.memory_space<vmem>>)
      %28 = arith.addi %0, %7 : i32
      %29 = arith.index_cast %28 : i32 to index
      %30 = memref.load %arg1[%29] : memref<64xi32, #tpu.memory_space<smem>>
      %c8_i32_22 = arith.constant 8 : i32
      %c0_i32_23 = arith.constant 0 : i32
      %31 = arith.cmpi eq, %c8_i32_22, %c0_i32_23 : i32
      %c1_i32_24 = arith.constant 1 : i32
      %32 = arith.select %31, %c1_i32_24, %c8_i32_22 : i32
      %33 = arith.remsi %7, %32 : i32
      %c0_i32_25 = arith.constant 0 : i32
      %34 = arith.cmpi ne, %33, %c0_i32_25 : i32
      %c0_i32_26 = arith.constant 0 : i32
      %35 = arith.cmpi slt, %33, %c0_i32_26 : i32
      %c0_i32_27 = arith.constant 0 : i32
      %36 = arith.cmpi slt, %32, %c0_i32_27 : i32
      %37 = arith.xori %35, %36 : i1
      %38 = arith.andi %37, %34 : i1
      %39 = arith.addi %33, %32 : i32
      %40 = arith.select %38, %39, %33 : i32
      %c0_i32_28 = arith.constant 0 : i32
      %41 = tpu.memref_slice %arg2[%30, %c0_i32_28] : memref<32x128xf32, #tpu.memory_space<any>> -> memref<1x128xf32, #tpu.memory_space<any>>
      %42 = tpu.memref_squeeze %41 : memref<1x128xf32, #tpu.memory_space<any>> -> memref<128xf32, #tpu.memory_space<any>>
      %c0_i32_29 = arith.constant 0 : i32
      %43 = tpu.memref_slice %arg4[%7, %c0_i32_29] : memref<64x128xf32, #tpu.memory_space<vmem>> -> memref<1x128xf32, #tpu.memory_space<vmem>>
      %44 = tpu.memref_squeeze %43 : memref<1x128xf32, #tpu.memory_space<vmem>> -> memref<128xf32, #tpu.memory_space<vmem>>
      %45 = tpu.memref_slice %arg5[%40] : memref<8x!tpu.dma_semaphore, #tpu.memory_space<semaphore_mem>> -> memref<1x!tpu.dma_semaphore, #tpu.memory_space<semaphore_mem>>
      %46 = tpu.memref_squeeze %45 : memref<1x!tpu.dma_semaphore, #tpu.memory_space<semaphore_mem>> -> memref<!tpu.dma_semaphore, #tpu.memory_space<semaphore_mem>>
      tpu.enqueue_dma source(%42 : memref<128xf32, #tpu.memory_space<any>>) target(%44 : memref<128xf32, #tpu.memory_space<vmem>>) target_semaphore(%46 : memref<!tpu.dma_semaphore, #tpu.memory_space<semaphore_mem>>)
    }
    %c56_i32_3 = arith.constant 56 : i32
    %c0_i32_4 = arith.constant 0 : i32
    %c8_i32_5 = arith.constant 8 : i32
    %3 = arith.addi %c0_i32_4, %c8_i32_5 : i32
    %c1_i32_6 = arith.constant 1 : i32
    scf.for %arg6 = %c0_i32_4 to %3 step %c1_i32_6  : i32 {
      %c1_i32_11 = arith.constant 1 : i32
      %6 = arith.muli %arg6, %c1_i32_11 : i32
      %c56_i32_12 = arith.constant 56 : i32
      %7 = arith.addi %c56_i32_12, %6 : i32
      %8 = arith.addi %0, %7 : i32
      %9 = arith.index_cast %8 : i32 to index
      %10 = memref.load %arg1[%9] : memref<64xi32, #tpu.memory_space<smem>>
      %c8_i32_13 = arith.constant 8 : i32
      %c0_i32_14 = arith.constant 0 : i32
      %11 = arith.cmpi eq, %c8_i32_13, %c0_i32_14 : i32
      %c1_i32_15 = arith.constant 1 : i32
      %12 = arith.select %11, %c1_i32_15, %c8_i32_13 : i32
      %13 = arith.remsi %7, %12 : i32
      %c0_i32_16 = arith.constant 0 : i32
      %14 = arith.cmpi ne, %13, %c0_i32_16 : i32
      %c0_i32_17 = arith.constant 0 : i32
      %15 = arith.cmpi slt, %13, %c0_i32_17 : i32
      %c0_i32_18 = arith.constant 0 : i32
      %16 = arith.cmpi slt, %12, %c0_i32_18 : i32
      %17 = arith.xori %15, %16 : i1
      %18 = arith.andi %17, %14 : i1
      %19 = arith.addi %13, %12 : i32
      %20 = arith.select %18, %19, %13 : i32
      %c0_i32_19 = arith.constant 0 : i32
      %21 = tpu.memref_slice %arg2[%10, %c0_i32_19] : memref<32x128xf32, #tpu.memory_space<any>> -> memref<1x128xf32, #tpu.memory_space<any>>
      %22 = tpu.memref_squeeze %21 : memref<1x128xf32, #tpu.memory_space<any>> -> memref<128xf32, #tpu.memory_space<any>>
      %c0_i32_20 = arith.constant 0 : i32
      %23 = tpu.memref_slice %arg4[%7, %c0_i32_20] : memref<64x128xf32, #tpu.memory_space<vmem>> -> memref<1x128xf32, #tpu.memory_space<vmem>>
      %24 = tpu.memref_squeeze %23 : memref<1x128xf32, #tpu.memory_space<vmem>> -> memref<128xf32, #tpu.memory_space<vmem>>
      %25 = tpu.memref_slice %arg5[%20] : memref<8x!tpu.dma_semaphore, #tpu.memory_space<semaphore_mem>> -> memref<1x!tpu.dma_semaphore, #tpu.memory_space<semaphore_mem>>
      %26 = tpu.memref_squeeze %25 : memref<1x!tpu.dma_semaphore, #tpu.memory_space<semaphore_mem>> -> memref<!tpu.dma_semaphore, #tpu.memory_space<semaphore_mem>>
      tpu.wait_dma2 semaphore(%26 : memref<!tpu.dma_semaphore, #tpu.memory_space<semaphore_mem>>) src(%22 : memref<128xf32, #tpu.memory_space<any>>) dst(%24 : memref<128xf32, #tpu.memory_space<vmem>>)
    }
    %c8_i32_7 = arith.constant 8 : i32
    %c0 = arith.constant 0 : index
    %c0_8 = arith.constant 0 : index
    %4 = vector.load %arg4[%c0, %c0_8] : memref<64x128xf32, #tpu.memory_space<vmem>>, vector<64x128xf32>
    %c0_9 = arith.constant 0 : index
    %c0_10 = arith.constant 0 : index
    %5 = vector.load %arg3[%c0_9, %c0_10] : memref<64x128xf32, #tpu.memory_space<vmem>>, vector<64x128xf32>
    tpu.vector_store %arg3[%c0_9, %c0_10], %4 {strides = array<i32>} : memref<64x128xf32, #tpu.memory_space<vmem>>, vector<64x128xf32>,
    return
  }
  func.func @transform_1(%arg0: i32, %arg1: memref<64xi32, #tpu.memory_space<smem>>) -> (i32, i32) {
    %c0_i32 = arith.constant 0 : i32
    %c0_i32_0 = arith.constant 0 : i32
    return %arg0, %c0_i32 : i32, i32
  }
}

</mosaic_0001>

<bundles_post_ra>
// kernel: tpu_custom_call.1
= control target key start
LH: loop header
LB: loop body
LE: loop exit
PB: predicated region body
PF: predicated region fallthrough
CT: control target
= control target key end

     0   :  { %s502_s0 = inlined_call_operand.hbm [shape: s32[64], index: 0, kind: input, shape index: {}]   ;;  %s503_s1 = inlined_call_operand.hbm [shape: f32[32,128], index: 1, kind: input, shape index: {}]   ;;  %s504_s2 = inlined_call_operand.hbm [shape: f32[64,128], index: 2, kind: output, shape index: {}]  }
   0x1   :  { %s288_s11 = scalar_lea.hbm %s502_s0, 16 }
   0x2   :  { %p289_p0 = scmp.ne.s32.totalorder %s502_s0, %s288_s11  ;;  %p292_p1 = scmp.lt.u32.totalorder %s288_s11, %s502_s0 }
   0x4   :  { %p294_p2 = pnand %p292_p1, %p289_p0 }
   0x6   :  { %297 = shalt.err (!%p294_p2)  }
   0x7   :  { %s400_s16 = smov [#allocation5]  }
   0x8   :  { %8 = dma.hbm_to_smem %s502_s0, 16, %s400_s16, [#allocation4] }
   0x9   :  { %380 = dma.done.wait [#allocation4], 16 }
   0xa   :  { %381 = vsyncadd [#allocation4], 4294967280 }
   0xb   :  { %10 = sfence }
   0xc   :  { %11 = vsyncpa [#allocation7], 0  ;;  %s432_s19 = smov 0  }
   0xd LB: > { %s20_s20 = sld [smem:[#allocation5 + %s390_s19]]  ;;  %p21_p3 = scmp.lt.s32.totalorder %s390_s19, 0  ;;  %s390_s19 = sphi %s432_s19, %s18_s19  }
   0xe   : > { %s22_s21 = ssub.s32 0, %s390_s19  ;;  %s35_s24 = scalar_lea.vmem [#allocation2], %s390_s19 }
   0xf   : > { %s238_s0 = smin.u32 %s390_s19, %s22_s21  ;;  %s44_s25 = sshll.u32 %s35_s24, 4  ;;  %s45_s25 = int_to_ptr.vmem [resolvable:$true] %s44_s25 }
  0x10   : > { %s24_s22 = sand.u32 7, %s238_s0   ;;  %s300_s7 = scalar_lea.hbm %s503_s1, 512 }
  0x11   : > { %s25_s23 = ssub.s32 0, %s24_s22 }
  0x12   : > { %s506_s23 = smov (!%p21_p3, %s25_s23), %s24_s22 }
  0x13   : > { %s241_s26 = sshll.u32 %s20_s20, 4  ;;  %p240_p4 = scmp.lt.s32.totalorder %s506_s23, 0 }
  0x14   : > { %s31_s27 = sadd.s32 8, %s506_s23  ;;  %s34_s30 = scalar_lea.hbm %s503_s1, %s241_s26 }
  0x15   : > { %s508_s27 = smov (!%p240_p4, %s31_s27), %s506_s23  ;;  %s298_s4 = scalar_lea.hbm %s34_s30, 16 }
  0x16   : > { %s36_s3 = scalar_lea.sflag [#allocation3], %s508_s27  ;;  %p299_p5 = scmp.ne.s32.totalorder %s34_s30, %s298_s4 }
  0x17   : > { %p301_p6 = scmp.lt.u32.totalorder %s34_s30, %s503_s1  ;;  %p302_p7 = scmp.lt.u32.totalorder %s300_s7, %s298_s4 }
  0x18   : > { %p304_p9 = scmp.lt.u32.totalorder %s298_s4, %s34_s30 }
  0x19   : > { %p303_p8 = por %p302_p7, %p301_p6 }
  0x1b   : > { %p305_p10 = por %p304_p9, %p303_p8 }
  0x1d   : > { %p306_p11 = pnand %p305_p10, %p299_p5 }
  0x1f   : > { %309 = shalt.err (!%p306_p11)  }
  0x20   : > { %s310_s12 = scalar_lea.vmem %s45_s25, 16  ;;  %s401_s13 = smov [#allocation2]  }
  0x21   : > { %p311_p12 = scmp.ne.s32.totalorder %s45_s25, %s310_s12  ;;  %s312_s14 = sshll.u32 %s401_s13, 4  ;;  %s455_s14 = int_to_ptr.vmem [resolvable:$false] %s312_s14 }
  0x22   : > { %s314_s15 = scalar_lea.vmem %s455_s14, 1024  ;;  %p315_p13 = scmp.lt.s32.totalorder %s45_s25, %s455_s14 }
  0x23   : > { %p316_p0 = scmp.lt.s32.totalorder %s314_s15, %s310_s12 }
  0x25   : > { %p317_p1 = por %p316_p0, %p315_p13 }
  0x27   : > { %p318_p2 = pnand %p317_p1, %p311_p12 }
  0x29   : > { %321 = shalt.err (!%p318_p2)  }
  0x2a   : > { %47 = dma.hbm_to_vmem [thread:$0]  %s34_s30, 16, %s45_s25, %s36_s3 }
  0x2b   : > { %s18_s19 = sadd.s32 1, %s390_s19  }
  0x2c   : > { %p15_p3 = scmp.ge.s32.totalorder %s18_s19, 8  }
  0x2d   :  { %s464_s16 = smov (%p15_p3), 0  }
  0x2e   :  { %17 = sbr.rel (!%p15_p3) target bundleno = 13 (0xd), region = 64 }
  0x35 LB: > { %s54_s17 = sadd.s32 8, %s394_s16  ;;  %p57_p4 = scmp.lt.s32.totalorder %s394_s16, 0  ;;  %s394_s16 = sphi %s464_s16, %s53_s16  }
  0x36   : > { %s58_s18 = ssub.s32 0, %s394_s16 }
  0x37   : > { %s242_s20 = smin.u32 %s394_s16, %s58_s18 }
  0x38   : > { %s60_s21 = sand.u32 7, %s242_s20  }
  0x39   : > { %s61_s0 = ssub.s32 0, %s60_s21 }
  0x3a   : > { %s510_s0 = smov (!%p57_p4, %s61_s0), %s60_s21 }
  0x3b   : > { %p244_p5 = scmp.lt.s32.totalorder %s510_s0, 0  ;;  %s67_s19 = sadd.s32 8, %s510_s0 }
  0x3d   : > { %s512_s19 = smov (!%p244_p5, %s67_s19), %s510_s0 }
  0x3e   : > { %s69_s22 = scalar_lea.sflag [#allocation3], %s512_s19 }
  0x3f   : > { %382 = dma.done.wait %s69_s22, 16 }
  0x40   : > { %383 = vsyncadd %s69_s22, 4294967280  ;;  %p74_p6 = scmp.lt.s32.totalorder %s54_s17, 0  ;;  %s75_s23 = ssub.s32 0, %s54_s17 }
  0x41   : > { %s73_s24 = sld [smem:[#allocation5 + %s54_s17]]  ;;  %s245_s25 = smin.u32 %s75_s23, %s54_s17 }
  0x42   : > { %s77_s26 = sand.u32 7, %s245_s25   ;;  %s219_s28 = scalar_lea.vmem [#allocation2], %s394_s16 }
  0x43   : > { %s78_s27 = ssub.s32 0, %s77_s26  ;;  %s220_s29 = scalar_lea.vmem %s219_s28, 8 [#allocation2] }
  0x44   : > { %s514_s27 = smov (!%p74_p6, %s78_s27), %s77_s26  ;;  %s97_s30 = sshll.u32 %s220_s29, 4  ;;  %s98_s30 = int_to_ptr.vmem [resolvable:$true] %s97_s30 }
  0x45   : > { %p247_p7 = scmp.lt.s32.totalorder %s514_s27, 0  ;;  %s84_s3 = sadd.s32 8, %s514_s27 }
  0x47   : > { %s248_s4 = sshll.u32 %s73_s24, 4  ;;  %s516_s3 = smov (!%p247_p7, %s84_s3), %s514_s27 }
  0x48   : > { %s87_s8 = scalar_lea.hbm %s503_s1, %s248_s4  ;;  %s89_s9 = scalar_lea.sflag [#allocation3], %s516_s3 }
  0x49   : > { %s322_s10 = scalar_lea.hbm %s87_s8, 16  ;;  %p325_p9 = scmp.lt.u32.totalorder %s87_s8, %s503_s1 }
  0x4a   : > { %p323_p8 = scmp.ne.s32.totalorder %s87_s8, %s322_s10  ;;  %p326_p10 = scmp.lt.u32.totalorder %s300_s7, %s322_s10 }
  0x4b   : > { %p328_p12 = scmp.lt.u32.totalorder %s322_s10, %s87_s8 }
  0x4c   : > { %p327_p11 = por %p326_p10, %p325_p9 }
  0x4e   : > { %p329_p13 = por %p328_p12, %p327_p11 }
  0x50   : > { %p330_p0 = pnand %p329_p13, %p323_p8 }
  0x52   : > { %333 = shalt.err (!%p330_p0)  }
  0x53   : > { %s334_s18 = scalar_lea.vmem %s98_s30, 16  ;;  %p339_p2 = scmp.lt.s32.totalorder %s98_s30, %s455_s14 }
  0x54   : > { %p335_p1 = scmp.ne.s32.totalorder %s98_s30, %s334_s18  ;;  %p340_p3 = scmp.lt.s32.totalorder %s314_s15, %s334_s18 }
  0x56   : > { %p341_p4 = por %p340_p3, %p339_p2 }
  0x58   : > { %p342_p5 = pnand %p341_p4, %p335_p1 }
  0x5a   : > { %345 = shalt.err (!%p342_p5)  }
  0x5b   : > { %100 = dma.hbm_to_vmem [thread:$0]  %s87_s8, 16, %s98_s30, %s89_s9 }
  0x5c   : > { %s53_s16 = sadd.s32 1, %s394_s16  }
  0x5d   : > { %p50_p6 = scmp.ge.s32.totalorder %s53_s16, 56  }
  0x5e   :  { %s396_s20 = smov (%p50_p6), 0  }
  0x5f   :  { %52 = sbr.rel (!%p50_p6) target bundleno = 53 (0x35), region = 75 }
  0x66 LB: > { %s107_s21 = sadd.s32 56, %s398_s20  ;;  %s398_s20 = sphi %s396_s20, %s106_s20  }
  0x67   : > { %p110_p7 = scmp.lt.s32.totalorder %s107_s21, 0  ;;  %s111_s0 = ssub.s32 0, %s107_s21 }
  0x68   : > { %s249_s19 = smin.u32 %s111_s0, %s107_s21 }
  0x69   : > { %s113_s22 = sand.u32 7, %s249_s19  }
  0x6a   : > { %s114_s23 = ssub.s32 0, %s113_s22 }
  0x6b   : > { %s518_s23 = smov (!%p110_p7, %s114_s23), %s113_s22 }
  0x6c   : > { %p251_p8 = scmp.lt.s32.totalorder %s518_s23, 0  ;;  %s120_s24 = sadd.s32 8, %s518_s23 }
  0x6e   : > { %s520_s24 = smov (!%p251_p8, %s120_s24), %s518_s23 }
  0x6f   : > { %s122_s25 = scalar_lea.sflag [#allocation3], %s520_s24 }
  0x70   : > { %384 = dma.done.wait %s122_s25, 16 }
  0x71   : > { %385 = vsyncadd %s122_s25, 4294967280  ;;  %s106_s20 = sadd.s32 1, %s398_s20  }
  0x72   : > { %p103_p9 = scmp.ge.s32.totalorder %s106_s20, 8  }
  0x73   :  { %v125_v0 = vld [vmem:[#allocation2] sm:$0xff] (%p103_p9)  ;;  %v126_v1 = vld [vmem:[#allocation2 + $0x8] sm:$0xff] (%p103_p9)  ;;  %v127_v2 = vld [vmem:[#allocation2 + $0x10] sm:$0xff] (%p103_p9)  ;;  %s402_s1 = smov (%p103_p9), [#allocation6]  }
  0x74   :  { %105 = sbr.rel (!%p103_p9) target bundleno = 102 (0x66), region = 86  ;;  %133 = vst [vmem:[#allocation6] sm:$0xff] (%p103_p9), %v125_v0  ;;  %134 = vst [vmem:[#allocation6 + $0x8] sm:$0xff] (%p103_p9), %v126_v1  ;;  %v128_v3 = vld [vmem:[#allocation2 + $0x18] sm:$0xff] (%p103_p9)  ;;  %v129_v4 = vld [vmem:[#allocation2 + $0x20] sm:$0xff] (%p103_p9)  ;;  %s146_s7 = sshll.u32 (%p103_p9), %s402_s1, 4  ;;  %s147_s7 = int_to_ptr.vmem [resolvable:$true] %s146_s7 }
  0x75   :  { %135 = vst [vmem:[#allocation6 + $0x10] sm:$0xff] (%p103_p9), %v127_v2  ;;  %v130_v5 = vld [vmem:[#allocation2 + $0x28] sm:$0xff] (%p103_p9)  ;;  %136 = vst [vmem:[#allocation6 + $0x18] sm:$0xff] (%p103_p9), %v128_v3  ;;  %v131_v6 = vld [vmem:[#allocation2 + $0x30] sm:$0xff] (%p103_p9)  ;;  %s346_s14 = scalar_lea.vmem (%p103_p9), %s147_s7, 1024  ;;  %p351_p11 = scmp.lt.s32.totalorder (%p103_p9), %s147_s7, %s147_s7 }
  0x76   :  { %137 = vst [vmem:[#allocation6 + $0x20] sm:$0xff] (%p103_p9), %v129_v4  ;;  %138 = vst [vmem:[#allocation6 + $0x28] sm:$0xff] (%p103_p9), %v130_v5  ;;  %v132_v7 = vld [vmem:[#allocation2 + $0x38] sm:$0xff] (%p103_p9)  ;;  %p347_p10 = scmp.ne.s32.totalorder (%p103_p9), %s147_s7, %s346_s14  ;;  %p352_p12 = scmp.lt.s32.totalorder (%p103_p9), %s346_s14, %s346_s14 }
  0x77   :  { %139 = vst [vmem:[#allocation6 + $0x30] sm:$0xff] (%p103_p9), %v131_v6  ;;  %140 = vst [vmem:[#allocation6 + $0x38] sm:$0xff] (%p103_p9), %v132_v7 }
  0x78   :  { %p353_p13 = por (%p103_p9), %p352_p12, %p351_p11 }
  0x7a   :  { %p354_p0 = pnand (%p103_p9), %p353_p13, %p347_p10 }
  0x7c   :  { %357 = shalt.err (!%p354_p0)
}
  0x7d   :  { %s358_s26 = scalar_lea.hbm %s504_s2, 1024 }
  0x7e   :  { %p359_p1 = scmp.ne.s32.totalorder %s504_s2, %s358_s26  ;;  %p362_p2 = scmp.lt.u32.totalorder %s358_s26, %s504_s2 }
  0x80   :  { %p364_p3 = pnand %p362_p2, %p359_p1 }
  0x82   :  { %367 = shalt.err (!%p364_p3)
}
  0x83   :  { %s403_s3 = smov 128   ;;  %s404_s4 = smov 8  }
  0x84   :  { %152 = dma.vmem_to_hbm [thread:$0]  %s147_s7, 1024, %s504_s2, [#allocation7], %s403_s3, %s403_s3, %s404_s4  }
  0x85   :  { %386 = dma.done.wait [#allocation7], 1024  }
  0x86   :  { %387 = vsyncadd [#allocation7], 4294966272 }
  0x87   :  { %156 = vsyncpa [#allocation7], 1 }
  0x88   :  { %157 = vsyncmov [#allocation3] }
  0x8b   :  { %s158_s8 = vpop.sfrf %157 }
  0x8c   :  { %p252_p4 = scmp.ne.s32.totalorder %s158_s8, 0 }
  0x8e   :  { %162 = shalt.err (%p252_p4)  }
  0x8f   :  { %164 = vsyncmov [#allocation3 + $0x1] }
  0x92   :  { %s165_s9 = vpop.sfrf %164 }
  0x93   :  { %p253_p5 = scmp.ne.s32.totalorder %s165_s9, 0 }
  0x95   :  { %169 = shalt.err (%p253_p5)  }
  0x96   :  { %171 = vsyncmov [#allocation3 + $0x2] }
  0x99   :  { %s172_s10 = vpop.sfrf %171 }
  0x9a   :  { %p254_p6 = scmp.ne.s32.totalorder %s172_s10, 0 }
  0x9c   :  { %176 = shalt.err (%p254_p6)  }
  0x9d   :  { %178 = vsyncmov [#allocation3 + $0x3] }
  0xa0   :  { %s179_s11 = vpop.sfrf %178 }
  0xa1   :  { %p255_p7 = scmp.ne.s32.totalorder %s179_s11, 0 }
  0xa3   :  { %183 = shalt.err (%p255_p7)  }
  0xa4   :  { %185 = vsyncmov [#allocation3 + $0x4] }
  0xa7   :  { %s186_s2 = vpop.sfrf %185 }
  0xa8   :  { %p256_p8 = scmp.ne.s32.totalorder %s186_s2, 0 }
  0xaa   :  { %190 = shalt.err (%p256_p8)  }
  0xab   :  { %192 = vsyncmov [#allocation3 + $0x5] }
  0xae   :  { %s193_s12 = vpop.sfrf %192 }
  0xaf   :  { %p257_p9 = scmp.ne.s32.totalorder %s193_s12, 0 }
  0xb1   :  { %197 = shalt.err (%p257_p9)  }
  0xb2   :  { %199 = vsyncmov [#allocation3 + $0x6] }
  0xb5   :  { %s200_s13 = vpop.sfrf %199 }
  0xb6   :  { %p258_p10 = scmp.ne.s32.totalorder %s200_s13, 0 }
  0xb8   :  { %204 = shalt.err (%p258_p10)  }
  0xb9   :  { %206 = vsyncmov [#allocation3 + $0x7] }
  0xbc   :  { %s207_s17 = vpop.sfrf %206 }
  0xbd   :  { %p259_p11 = scmp.ne.s32.totalorder %s207_s17, 0 }
  0xbf   :  { %211 = shalt.err (%p259_p11)  }

</bundles_post_ra>
